<compile_context>
chip_gen: v7x
topology: tpu7x:2x2x1
jax: 0.10.0
libtpu: 0.0.40
codegen_flags: <defaults>
</compile_context>

<pallas_src>
import jax
import jax.numpy as jnp
from jax.experimental import pallas as pl
from jax.experimental.pallas import tpu as pltpu

LANE = 128               # last-dim lane width of the 2D slab
MAX_BLOCK_ROWS = 8192    # 8192 * 128 * 4B = 4 MiB per f32 block


def _sigmoid_kernel(x_ref, o_ref):
    # Upcast to f32 for exp (matters for bf16 on v5e, no-op for f32),
    # cast back to the I/O dtype on store.
    x = x_ref[...].astype(jnp.float32)
    o_ref[...] = pl.reciprocal(1.0 + jnp.exp(-x)).astype(o_ref.dtype)


def _sigmoid_2d(x2d: jax.Array) -> jax.Array:
    """Elementwise sigmoid of a (rows, 128) slab via a Pallas TPU kernel."""
    rows, lane = x2d.shape
    if rows <= MAX_BLOCK_ROWS:
        # Full-extent block: always layout-legal (equals full array dims).
        block_rows = rows
    else:
        # Multiple of 8 -> legal block; last block may be partial (Pallas
        # pads reads / masks writes for the out-of-bounds rows).
        block_rows = MAX_BLOCK_ROWS
    grid = (pl.cdiv(rows, block_rows),)

    nbytes = x2d.size * jnp.dtype(x2d.dtype).itemsize
    return pl.pallas_call(
        _sigmoid_kernel,
        out_shape=jax.ShapeDtypeStruct((rows, lane), x2d.dtype),
        grid_spec=pltpu.PrefetchScalarGridSpec(
            num_scalar_prefetch=0,
            grid=grid,
            in_specs=[pl.BlockSpec((block_rows, lane), lambda i: (i, 0))],
            out_specs=pl.BlockSpec((block_rows, lane), lambda i: (i, 0)),
        ),
        compiler_params=pltpu.CompilerParams(
            dimension_semantics=("parallel",),
            vmem_limit_bytes=32 << 20,
        ),
        cost_estimate=pl.CostEstimate(
            flops=4 * int(x2d.size),
            transcendentals=int(x2d.size),
            bytes_accessed=2 * int(nbytes),
        ),
    )(x2d)


def pallas_sigmoid(x: jax.Array) -> jax.Array:
    """Elementwise sigmoid matching torch.sigmoid / mysigmoid2.forward."""
    orig_shape = x.shape
    total = x.size
    flat = x.reshape(-1)

    main = (total // LANE) * LANE
    if main == 0:
        # Tiny input (< 128 elements): not worth a kernel launch.
        return jax.nn.sigmoid(x)

    rows = main // LANE
    tail = total - main
    if tail == 0:
        main_in = flat.reshape(rows, LANE)          # free reshape, no copy
    else:
        main_in = flat[:main].reshape(rows, LANE)

    main_out = _sigmoid_2d(main_in).reshape(-1)

    if tail:
        tail_out = jax.nn.sigmoid(flat[main:])      # < 128 elements
        out_flat = jnp.concatenate([main_out, tail_out])
    else:
        out_flat = main_out
    return out_flat.reshape(orig_shape)


class Test:
    """Mirror of the PyTorch Test module: forward(x) -> sigmoid(x)."""
    # TODO(synk): backward (custom autograd grad) of MySigmoid is not translated;
    # only the forward pass is implemented here.

    def __init__(self):
        self._fn = jax.jit(pallas_sigmoid)

    def __call__(self, x):
        return self._fn(x)


if __name__ == "__main__":
    key = jax.random.PRNGKey(0)
    model = Test()

    # Small NCHW input consistent with the module (elementwise op).
    x = jax.random.normal(key, (2, 4, 16, 16), dtype=jnp.float32)
    y = jax.block_until_ready(model(x))
    ref = jax.nn.sigmoid(x)
    assert y.shape == x.shape and y.dtype == x.dtype
    assert jnp.allclose(y, ref, atol=1e-6, rtol=1e-5)

    # Secondary check: odd size exercising the non-multiple-of-8 rows path
    # and the <128-element tail path.
    x2 = jax.random.normal(jax.random.PRNGKey(1), (3, 5, 7, 11), dtype=jnp.float32)
    y2 = jax.block_until_ready(model(x2))
    assert jnp.allclose(y2, jax.nn.sigmoid(x2), atol=1e-6, rtol=1e-5)

    print("KERNEL_OK")
</pallas_src>

<mosaic_0001>
module attributes {stable_mosaic.version = 11 : i64} {
  func.func @_sigmoid_kernel(%arg0: i32, %arg1: memref<16x128xf32, #tpu.memory_space<vmem>>, %arg2: memref<16x128xf32, #tpu.memory_space<vmem>>) attributes {dimension_semantics = [#tpu.dimension_semantics<parallel>], iteration_bounds = array<i64: 1>, scalar_prefetch = 0 : i64, scratch_operands = 0 : i64, tpu.core_type = #tpu.core_type<tc>, window_params = [{transform_indices = @transform_0, window_bounds = array<i64: 16, 128>}, {transform_indices = @transform_1, window_bounds = array<i64: 16, 128>}]} {
    %c0 = arith.constant 0 : index
    %c0_0 = arith.constant 0 : index
    %0 = vector.load %arg1[%c0, %c0_0] : memref<16x128xf32, #tpu.memory_space<vmem>>, vector<16x128xf32>
    %cst = arith.constant 0.000000e+00 : f32
    %1 = vector.broadcast %cst : f32 to vector<16x128xf32>
    %2 = arith.subf %1, %0 : vector<16x128xf32>
    %3 = math.exp %2 : vector<16x128xf32>
    %cst_1 = arith.constant 1.000000e+00 : f32
    %4 = vector.broadcast %cst_1 : f32 to vector<16x128xf32>
    %5 = arith.addf %4, %3 : vector<16x128xf32>
    %6 = tpu.reciprocal %5 : vector<16x128xf32> -> vector<16x128xf32>
    %c0_2 = arith.constant 0 : index
    %c0_3 = arith.constant 0 : index
    %7 = vector.load %arg2[%c0_2, %c0_3] : memref<16x128xf32, #tpu.memory_space<vmem>>, vector<16x128xf32>
    tpu.vector_store %arg2[%c0_2, %c0_3], %6 {strides = array<i32>} : memref<16x128xf32, #tpu.memory_space<vmem>>, vector<16x128xf32>,
    return
  }
  func.func @transform_0(%arg0: i32) -> (i32, i32) {
    %c0_i32 = arith.constant 0 : i32
    %c0_i32_0 = arith.constant 0 : i32
    return %arg0, %c0_i32 : i32, i32
  }
  func.func @transform_1(%arg0: i32) -> (i32, i32) {
    %c0_i32 = arith.constant 0 : i32
    %c0_i32_0 = arith.constant 0 : i32
    return %arg0, %c0_i32 : i32, i32
  }
}

</mosaic_0001>

<bundles_post_ra>
// kernel: pallas_sigmoid.1
= control target key start
LH: loop header
LB: loop body
LE: loop exit
PB: predicated region body
PF: predicated region fallthrough
CT: control target
= control target key end

     0   :  { %s56_s0 = inlined_call_operand.vmem [shape: f32[16,128], index: 0, kind: input, shape index: {}]   ;;  %s57_s1 = inlined_call_operand.vmem [shape: f32[16,128], index: 1, kind: output, shape index: {}]  }
   0x1   :  { %v8_v0 = vld [vmem:[%s56_s0] sm:$0xff]  ;;  %v9_v1 = vld [vmem:[%s56_s0 + $0x8] sm:$0xff] }
   0x2   :  { %v10_v2 = vsub.f32 0.0, %v8_v0  ;;  %v11_v3 = vsub.f32 0.0, %v9_v1 }
   0x4   :  { %v12_v4 = vmul.f32 1.442695, %v10_v2  ;;  %v14_v5 = vmul.f32 1.442695, %v11_v3 }
   0x6   :  { %26 = vpow2.f32 %v12_v4 }
   0x7   :  { %28 = vpow2.f32 %v14_v5 }
  0x10   :  { %v27_v6 = vpop.eup %26 }
  0x11   :  { %v29_v7 = vpop.eup %28  ;;  %v16_v8 = vadd.f32 1.0, %v27_v6 }
  0x12   :  { %v17_v9 = vadd.f32 1.0, %v29_v7 }
  0x13   :  { %30 = vrcp.f32 %v16_v8 }
  0x14   :  { %32 = vrcp.f32 %v17_v9 }
  0x1d   :  { %v31_v10 = vpop.eup %30 }
  0x1e   :  { %v33_v11 = vpop.eup %32  ;;  %20 = vst [vmem:[%s57_s1] sm:$0xff] %v31_v10 }
  0x1f   :  { %21 = vst [vmem:[%s57_s1 + $0x8] sm:$0xff] %v33_v11 }

</bundles_post_ra>
